<compile_context>
chip_gen: v7x
topology: tpu7x:2x2x1
jax: 0.10.0
libtpu: 0.0.40
codegen_flags: <defaults>
</compile_context>

<pallas_src>
import functools

import jax
import jax.numpy as jnp
from jax.experimental import pallas as pl
from jax.experimental.pallas import tpu as pltpu


def _round_up(x, m):
    return ((x + m - 1) // m) * m


def _simple_layer_kernel(x_ref, w_ref, b_ref, o_ref, *, activation, k_steps):
    """Computes one (tm, N_pad) output tile. Grid = (M tiles, K tiles)."""
    if k_steps == 1:
        # Single-step path: one fused dot + bias + activation, no phases.
        acc = jnp.dot(x_ref[...], w_ref[...], preferred_element_type=jnp.float32)
        acc = acc + b_ref[...]  # (1, N_pad) broadcasts over rows
        if activation == "relu":
            acc = jnp.maximum(acc, 0.0)
        o_ref[...] = acc
    else:
        k = pl.program_id(1)

        @pl.when(k == 0)
        def _init():
            o_ref[...] = jnp.zeros_like(o_ref)

        # Output block index is constant along the K axis -> o_ref is
        # VMEM-resident; accumulate directly into the f32 output (no scratch).
        o_ref[...] += jnp.dot(
            x_ref[...], w_ref[...], preferred_element_type=jnp.float32
        )

        @pl.when(k == k_steps - 1)
        def _finalize():
            out = o_ref[...] + b_ref[...]
            if activation == "relu":
                out = jnp.maximum(out, 0.0)
            o_ref[...] = out


def simple_layer_forward(
    x,
    W_core,
    b_core,
    *,
    activation="linear",
    compute_dtype=jnp.bfloat16,
    output_size_original=None,
):
    """Pallas implementation of Simple_Layer.forward (p_dict=None).

    x       : (batch, *input_size_original)  -- e.g. NCHW
    W_core  : (input_size, output_size)
    b_core  : (output_size,)
    """
    if activation not in ("linear", "relu"):
        raise ValueError(f"activation '{activation}' not supported")

    num_examples = x.shape[0]
    K, N = W_core.shape

    # torch: output = input.view(-1, input_size)
    x2d = jnp.reshape(x, (-1, K))
    assert x2d.shape[0] == num_examples, "input_size mismatch with given tensor!"
    M = x2d.shape[0]
    out_dtype = x2d.dtype

    # ---- pad to TPU-friendly (lane/sublane dense) shapes -------------------
    N_pad = _round_up(N, 128)   # lane-dense output / full MXU columns
    K_pad = _round_up(K, 128)
    M8 = _round_up(M, 8)        # sublane height

    # M tiling: biggest tile up to 512 rows (fits v7x 64 MiB comfortably);
    # the M axis is "parallel" so v7x's two TensorCores share the work.
    tm = min(512, M8)
    M_pad = _round_up(M8, tm)
    m_steps = M_pad // tm

    # K tiling: single step unless K is large; tiles stay multiples of 128.
    tk = K_pad if K_pad <= 2048 else 1024
    K_pad = _round_up(K_pad, tk)
    k_steps = K_pad // tk

    # Zero-pad inputs (zero rows/cols contribute nothing to the matmul).
    x_p = jnp.zeros((M_pad, K_pad), compute_dtype).at[:M, :K].set(
        x2d.astype(compute_dtype)
    )
    w_p = jnp.zeros((K_pad, N_pad), compute_dtype).at[:K, :N].set(
        W_core.astype(compute_dtype)
    )
    b_p = jnp.zeros((1, N_pad), jnp.float32).at[0, :N].set(
        b_core.astype(jnp.float32)
    )

    kernel = functools.partial(
        _simple_layer_kernel, activation=activation, k_steps=k_steps
    )

    out_p = pl.pallas_call(
        kernel,
        out_shape=jax.ShapeDtypeStruct((M_pad, N_pad), jnp.float32),
        grid_spec=pltpu.PrefetchScalarGridSpec(
            num_scalar_prefetch=0,
            grid=(m_steps, k_steps),              # reduction axis last
            in_specs=[
                pl.BlockSpec((tm, tk), lambda m, k: (m, k)),      # activations
                pl.BlockSpec((tk, N_pad), lambda m, k: (k, 0)),   # weights
                pl.BlockSpec((1, N_pad), lambda m, k: (0, 0)),    # bias (resident)
            ],
            out_specs=pl.BlockSpec((tm, N_pad), lambda m, k: (m, 0)),
        ),
        compiler_params=pltpu.CompilerParams(
            dimension_semantics=("parallel", "arbitrary"),
        ),
    )(x_p, w_p, b_p)

    out = out_p[:M, :N].astype(out_dtype)

    # torch: output = output.view(*(-1,) + self.output_size_original)
    if output_size_original is not None:
        out = jnp.reshape(out, (-1,) + tuple(output_size_original))

    # TODO(synk): p_dict modulation of output column 0 (rarely used) not implemented.
    return out


if __name__ == "__main__":
    # Module config: input_size = (4, 16, 16) -> 1024, output_size = 32,
    # activation left at "linear".
    batch = 2
    input_size_original = (4, 16, 16)
    input_size = 4 * 16 * 16
    output_size = 32
    activation = "linear"

    key = jax.random.PRNGKey(0)
    kx, kw = jax.random.split(key)

    # Deterministic parameter init (mirrors torch.randn / torch.zeros in __init__).
    x = jax.random.normal(kx, (batch,) + input_size_original, dtype=jnp.float32)
    W_core = jax.random.normal(kw, (input_size, output_size), dtype=jnp.float32)
    b_core = jnp.zeros((output_size,), dtype=jnp.float32)

    out = simple_layer_forward(x, W_core, b_core, activation=activation)
    out = jax.block_until_ready(out)

    # Pure-JAX reference using the same bf16-in / f32-accumulate matmul.
    x2d = jnp.reshape(x, (-1, input_size))
    ref = (
        jnp.dot(
            x2d.astype(jnp.bfloat16),
            W_core.astype(jnp.bfloat16),
            preferred_element_type=jnp.float32,
        )
        + b_core
    )
    if activation == "relu":
        ref = jnp.maximum(ref, 0.0)

    assert out.shape == (batch, output_size)
    assert jnp.allclose(out, ref, atol=1e-2, rtol=1e-2), "mismatch vs reference"
    print("KERNEL_OK")
</pallas_src>

<mosaic_0001>
module attributes {stable_mosaic.version = 11 : i64} {
  func.func @_simple_layer_kernel(%arg0: i32, %arg1: i32, %arg2: memref<8x1024xbf16, #tpu.memory_space<vmem>>, %arg3: memref<1024x128xbf16, #tpu.memory_space<vmem>>, %arg4: memref<1x128xf32, #tpu.memory_space<vmem>>, %arg5: memref<8x128xf32, #tpu.memory_space<vmem>>) attributes {dimension_semantics = [#tpu.dimension_semantics<parallel>, #tpu.dimension_semantics<arbitrary>], iteration_bounds = array<i64: 1, 1>, scalar_prefetch = 0 : i64, scratch_operands = 0 : i64, tpu.core_type = #tpu.core_type<tc>, window_params = [{transform_indices = @transform_0, window_bounds = array<i64: 8, 1024>}, {transform_indices = @transform_1, window_bounds = array<i64: 1024, 128>}, {pipeline_mode = #tpu.pipeline_mode<synchronous>, transform_indices = @transform_2, window_bounds = array<i64: 1, 128>}, {transform_indices = @transform_3, window_bounds = array<i64: 8, 128>}]} {
    %c0 = arith.constant 0 : index
    %c0_0 = arith.constant 0 : index
    %0 = vector.load %arg2[%c0, %c0_0] : memref<8x1024xbf16, #tpu.memory_space<vmem>>, vector<8x1024xbf16>
    %c0_1 = arith.constant 0 : index
    %c0_2 = arith.constant 0 : index
    %1 = vector.load %arg3[%c0_1, %c0_2] : memref<1024x128xbf16, #tpu.memory_space<vmem>>, vector<1024x128xbf16>
    %cst = arith.constant dense<0.000000e+00> : vector<8x128xf32>
    %2 = tpu.matmul %0, %1, %cst {dimension_numbers = #tpu.dot_dimension_numbers<[1], [0], [0], [1], [0, 0, 1, 1], [], []>} : vector<8x1024xbf16>, vector<1024x128xbf16>, vector<8x128xf32> -> vector<8x128xf32>
    %c0_3 = arith.constant 0 : index
    %c0_4 = arith.constant 0 : index
    %3 = vector.load %arg4[%c0_3, %c0_4] : memref<1x128xf32, #tpu.memory_space<vmem>>, vector<1x128xf32>
    %4 = vector.broadcast %3 : vector<1x128xf32> to vector<8x128xf32>
    %5 = arith.addf %2, %4 : vector<8x128xf32>
    %c0_5 = arith.constant 0 : index
    %c0_6 = arith.constant 0 : index
    %6 = vector.load %arg5[%c0_5, %c0_6] : memref<8x128xf32, #tpu.memory_space<vmem>>, vector<8x128xf32>
    tpu.vector_store %arg5[%c0_5, %c0_6], %5 {strides = array<i32>} : memref<8x128xf32, #tpu.memory_space<vmem>>, vector<8x128xf32>,
    return
  }
  func.func @transform_0(%arg0: i32, %arg1: i32) -> (i32, i32) {
    %c0_i32 = arith.constant 0 : i32
    return %arg0, %arg1 : i32, i32
  }
  func.func @transform_1(%arg0: i32, %arg1: i32) -> (i32, i32) {
    %c0_i32 = arith.constant 0 : i32
    %c0_i32_0 = arith.constant 0 : i32
    return %arg1, %c0_i32 : i32, i32
  }
  func.func @transform_2(%arg0: i32, %arg1: i32) -> (i32, i32) {
    %c0_i32 = arith.constant 0 : i32
    %c0_i32_0 = arith.constant 0 : i32
    %c0_i32_1 = arith.constant 0 : i32
    return %c0_i32, %c0_i32_0 : i32, i32
  }
  func.func @transform_3(%arg0: i32, %arg1: i32) -> (i32, i32) {
    %c0_i32 = arith.constant 0 : i32
    %c0_i32_0 = arith.constant 0 : i32
    return %arg0, %c0_i32 : i32, i32
  }
}

</mosaic_0001>

<bundles_post_ra>
// kernel: tpu_custom_call.1
= control target key start
LH: loop header
LB: loop body
LE: loop exit
PB: predicated region body
PF: predicated region fallthrough
CT: control target
= control target key end

     0   :  { %8 = vsyncpa [#allocation3], 0  ;;  %s1151_s0 = inlined_call_operand.hbm [shape: bf16[8,1024], index: 0, kind: input, shape index: {}]   ;;  %s1152_s1 = inlined_call_operand.hbm [shape: bf16[1024,128], index: 1, kind: input, shape index: {}]   ;;  %s1153_s2 = inlined_call_operand.vmem [shape: f32[1,128], index: 2, kind: input, shape index: {}]   ;;  %s1154_s3 = inlined_call_operand.hbm [shape: f32[8,128], index: 3, kind: output, shape index: {}]  }
   0x1   :  { %9 = vsyncpa [#allocation6], 0 }
   0x2   :  { %10 = vsyncpa [#allocation4], 0  ;;  %s1080_s12 = smov [#allocation2]   ;;  %s1081_s14 = smov [#allocation5]  }
   0x3   :  { %s17_s13 = sshll.u32 %s1080_s12, 4  ;;  %s26_s15 = sshll.u32 %s1081_s14, 4  ;;  %s18_s13 = int_to_ptr.vmem [resolvable:$true] %s17_s13  ;;  %s1105_s15 = int_to_ptr.vmem [resolvable:$true] %s26_s15 }
   0x4   :  { %s1008_s18 = scalar_lea.hbm %s1151_s0, 512 }
   0x5   :  { %p1009_p0 = scmp.ne.s32.totalorder %s1151_s0, %s1008_s18  ;;  %p1012_p1 = scmp.lt.u32.totalorder %s1008_s18, %s1151_s0 }
   0x7   :  { %p1014_p2 = pnand %p1012_p1, %p1009_p0 }
   0x9   :  { %1017 = shalt.err (!%p1014_p2)
}
   0xa   :  { %s1018_s23 = scalar_lea.vmem %s18_s13, 512  ;;  %p1023_p4 = scmp.lt.s32.totalorder %s18_s13, %s18_s13 }
   0xb   :  { %p1019_p3 = scmp.ne.s32.totalorder %s18_s13, %s1018_s23  ;;  %p1024_p5 = scmp.lt.s32.totalorder %s1018_s23, %s1018_s23 }
   0xd   :  { %p1025_p6 = por %p1024_p5, %p1023_p4 }
   0xf   :  { %p1026_p7 = pnand %p1025_p6, %p1019_p3 }
  0x11   :  { %1029 = shalt.err (!%p1026_p7)
}
  0x12   :  { %20 = dma.hbm_to_vmem [thread:$0]  %s1151_s0, 512, %s18_s13, [#allocation3]  }
  0x13   :  { %s1030_s28 = scalar_lea.hbm %s1152_s1, 8192 }
  0x14   :  { %p1031_p8 = scmp.ne.s32.totalorder %s1152_s1, %s1030_s28  ;;  %p1034_p9 = scmp.lt.u32.totalorder %s1030_s28, %s1152_s1 }
  0x16   :  { %p1036_p10 = pnand %p1034_p9, %p1031_p8 }
  0x18   :  { %1039 = shalt.err (!%p1036_p10)
}
  0x19   :  { %s1040_s6 = scalar_lea.vmem %s1105_s15, 8192  ;;  %p1045_p12 = scmp.lt.s32.totalorder %s1105_s15, %s1105_s15 }
  0x1a   :  { %p1041_p11 = scmp.ne.s32.totalorder %s1105_s15, %s1040_s6  ;;  %p1046_p13 = scmp.lt.s32.totalorder %s1040_s6, %s1040_s6 }
  0x1c   :  { %p1047_p0 = por %p1046_p13, %p1045_p12 }
  0x1e   :  { %p1048_p1 = pnand %p1047_p0, %p1041_p11 }
  0x20   :  { %1051 = shalt.err (!%p1048_p1)
}
  0x21   :  { %s1082_s0 = smov 64   ;;  %s1083_s7 = smov 4  }
  0x22   :  { %32 = dma.hbm_to_vmem [thread:$0]  %s1152_s1, 8192, %s1105_s15, [#allocation6], %s1082_s0, %s1082_s0, %s1083_s7  }
  0x23   :  { %1074 = dma.done.wait [#allocation3], 512  }
  0x24   :  { %1075 = vsyncadd [#allocation3], 4294966784 }
  0x25   :  { %1076 = dma.done.wait [#allocation6], 8192  }
  0x26   :  { %1077 = vsyncadd [#allocation6], 4294959104  ;;  %v936_v0 = vld [vmem:[#allocation5 + $0x40] sm:$0xff]   ;;  %v940_v4 = vld [vmem:[#allocation5 + $0x48] sm:$0xff]  }
  0x27   :  { %v937_v1 = vld [vmem:[#allocation5 + $0xc0] sm:$0xff]   ;;  %843 = vmatprep.subr.bf16.mxu0 %v936_v0  ;;  %v941_v5 = vld [vmem:[#allocation5 + $0xc8] sm:$0xff]   ;;  %v944_v8 = vld [vmem:[#allocation5 + $0x50] sm:$0xff]  }
  0x28   :  { %v938_v2 = vld [vmem:[#allocation5] sm:$0xff]   ;;  %865 = vmatprep.subr.bf16.mxu1 %v937_v1  ;;  %v942_v6 = vld [vmem:[#allocation5 + $0x8] sm:$0xff]   ;;  %v945_v9 = vld [vmem:[#allocation5 + $0xd0] sm:$0xff]  }
  0x29   :  { %v939_v3 = vld [vmem:[#allocation5 + $0x80] sm:$0xff]   ;;  %844 = vmatpush3.bf16.msra.mxu0 %v938_v2  ;;  %v943_v7 = vld [vmem:[#allocation5 + $0x88] sm:$0xff]   ;;  %v946_v10 = vld [vmem:[#allocation5 + $0x10] sm:$0xff]  }
  0x2a   :  { %866 = vmatpush3.bf16.msra.mxu1 %v939_v3  ;;  %845 = vmatprep.subr.bf16.mxu0 %v940_v4  ;;  %v947_v11 = vld [vmem:[#allocation5 + $0x90] sm:$0xff]   ;;  %v948_v12 = vld [vmem:[#allocation5 + $0x58] sm:$0xff]   ;;  %v952_v16 = vld [vmem:[#allocation5 + $0x60] sm:$0xff]  }
  0x2b   :  { %867 = vmatprep.subr.bf16.mxu1 %v941_v5  ;;  %v949_v13 = vld [vmem:[#allocation5 + $0xd8] sm:$0xff]   ;;  %v953_v17 = vld [vmem:[#allocation5 + $0xe0] sm:$0xff]   ;;  %v956_v20 = vld [vmem:[#allocation5 + $0x68] sm:$0xff]  }
  0x2c   :  { %v950_v14 = vld [vmem:[#allocation5 + $0x18] sm:$0xff]   ;;  %v954_v18 = vld [vmem:[#allocation5 + $0x20] sm:$0xff]   ;;  %v957_v21 = vld [vmem:[#allocation5 + $0xe8] sm:$0xff]  }
  0x2d   :  { %846 = vmatpush3.bf16.msra.mxu0 %v942_v6  ;;  %v951_v15 = vld [vmem:[#allocation5 + $0x98] sm:$0xff]   ;;  %v955_v19 = vld [vmem:[#allocation5 + $0xa0] sm:$0xff]   ;;  %v958_v22 = vld [vmem:[#allocation5 + $0x28] sm:$0xff]  }
  0x2e   :  { %868 = vmatpush3.bf16.msra.mxu1 %v943_v7  ;;  %847 = vmatprep.subr.bf16.mxu0 %v944_v8  ;;  %v959_v23 = vld [vmem:[#allocation5 + $0xa8] sm:$0xff]   ;;  %v960_v24 = vld [vmem:[#allocation5 + $0x70] sm:$0xff]   ;;  %v964_v28 = vld [vmem:[#allocation5 + $0x78] sm:$0xff]  }
  0x2f   :  { %869 = vmatprep.subr.bf16.mxu1 %v945_v9  ;;  %v961_v25 = vld [vmem:[#allocation5 + $0xf0] sm:$0xff]   ;;  %v965_v29 = vld [vmem:[#allocation5 + $0xf8] sm:$0xff]   ;;  %v42_v32 = vld [vmem:[#allocation2] sm:$0xff] }
  0x30   :  { %v962_v26 = vld [vmem:[#allocation5 + $0x30] sm:$0xff]   ;;  %v966_v30 = vld [vmem:[#allocation5 + $0x38] sm:$0xff]   ;;  %v43_v33 = vld [vmem:[#allocation2 + $0x8] sm:$0xff]  ;;  %v771_v34 = vcombine.low %v42_v32, %v42_v32  ;;  %v772_v35 = vcombine.high %v42_v32, %v42_v32 }
  0x31   :  { %848 = vmatpush3.bf16.msra.mxu0 %v946_v10  ;;  %v963_v27 = vld [vmem:[#allocation5 + $0xb0] sm:$0xff]   ;;  %v967_v31 = vld [vmem:[#allocation5 + $0xb8] sm:$0xff]   ;;  %v773_v36 = vcombine.low %v43_v33, %v43_v33  ;;  %v774_v37 = vcombine.high %v43_v33, %v43_v33  ;;  %v972_v38 = vld [vmem:[#allocation5 + $0x140] sm:$0xff]  }
  0x32   :  { %870 = vmatpush3.bf16.msra.mxu1 %v947_v11  ;;  %849 = vmatprep.subr.bf16.mxu0 %v948_v12  ;;  %v973_v39 = vld [vmem:[#allocation5 + $0x1c0] sm:$0xff]   ;;  %v976_v42 = vld [vmem:[#allocation5 + $0x148] sm:$0xff]   ;;  %v980_v46 = vld [vmem:[#allocation5 + $0x150] sm:$0xff]  }
  0x33   :  { %871 = vmatprep.subr.bf16.mxu1 %v949_v13  ;;  %625 = vmatprep.mubr.bf16.mxu0 %v772_v35  ;;  %v974_v40 = vld [vmem:[#allocation5 + $0x100] sm:$0xff]   ;;  %v977_v43 = vld [vmem:[#allocation5 + $0x1c8] sm:$0xff]   ;;  %v981_v47 = vld [vmem:[#allocation5 + $0x1d0] sm:$0xff]  }
  0x34   :  { %665 = vmatprep.mubr.bf16.mxu1 %v774_v37  ;;  %v975_v41 = vld [vmem:[#allocation5 + $0x180] sm:$0xff]   ;;  %v978_v44 = vld [vmem:[#allocation5 + $0x108] sm:$0xff]   ;;  %v982_v48 = vld [vmem:[#allocation5 + $0x110] sm:$0xff]  }
  0x35   :  { %850 = vmatpush3.bf16.msra.mxu0 %v950_v14  ;;  %v979_v45 = vld [vmem:[#allocation5 + $0x188] sm:$0xff]   ;;  %v983_v49 = vld [vmem:[#allocation5 + $0x190] sm:$0xff]   ;;  %v984_v50 = vld [vmem:[#allocation5 + $0x158] sm:$0xff]  }
  0x36   :  { %872 = vmatpush3.bf16.msra.mxu1 %v951_v15  ;;  %851 = vmatprep.subr.bf16.mxu0 %v952_v16  ;;  %v985_v51 = vld [vmem:[#allocation5 + $0x1d8] sm:$0xff]   ;;  %v988_v54 = vld [vmem:[#allocation5 + $0x160] sm:$0xff]   ;;  %v992_v58 = vld [vmem:[#allocation5 + $0x168] sm:$0xff]  }
  0x37   :  { %873 = vmatprep.subr.bf16.mxu1 %v953_v17  ;;  %v986_v52 = vld [vmem:[#allocation5 + $0x118] sm:$0xff]   ;;  %v989_v55 = vld [vmem:[#allocation5 + $0x1e0] sm:$0xff]   ;;  %v993_v59 = vld [vmem:[#allocation5 + $0x1e8] sm:$0xff]  }
  0x38   :  { %v987_v53 = vld [vmem:[#allocation5 + $0x198] sm:$0xff]   ;;  %v990_v56 = vld [vmem:[#allocation5 + $0x120] sm:$0xff]   ;;  %v994_v60 = vld [vmem:[#allocation5 + $0x128] sm:$0xff]  }
  0x39   :  { %852 = vmatpush3.bf16.msra.mxu0 %v954_v18  ;;  %v991_v57 = vld [vmem:[#allocation5 + $0x1a0] sm:$0xff]   ;;  %v995_v61 = vld [vmem:[#allocation5 + $0x1a8] sm:$0xff]   ;;  %v996_v62 = vld [vmem:[#allocation5 + $0x170] sm:$0xff]  }
  0x3a   :  { %874 = vmatpush3.bf16.msra.mxu1 %v955_v19  ;;  %853 = vmatprep.subr.bf16.mxu0 %v956_v20  ;;  %v997_v63 = vld [vmem:[#allocation5 + $0x1f0] sm:$0xff]   ;;  %v1000_v2 = vld [vmem:[#allocation5 + $0x178] sm:$0xff]   ;;  %v770_v14 = vld [vmem:[%s1153_s2] ss:$0 sm:$0xff]  ;;  %s1084_s2 = smov [#allocation7]  }
  0x3b   :  { %875 = vmatprep.subr.bf16.mxu1 %v957_v21  ;;  %v998_v0 = vld [vmem:[#allocation5 + $0x130] sm:$0xff]   ;;  %v1001_v3 = vld [vmem:[#allocation5 + $0x1f8] sm:$0xff]   ;;  %s760_s11 = sshll.u32 %s1084_s2, 4  ;;  %s761_s11 = int_to_ptr.vmem [resolvable:$true] %s760_s11 }
  0x3c   :  { %v999_v1 = vld [vmem:[#allocation5 + $0x1b0] sm:$0xff]   ;;  %v1002_v4 = vld [vmem:[#allocation5 + $0x138] sm:$0xff]   ;;  %s1052_s12 = scalar_lea.vmem %s761_s11, 128  ;;  %p1057_p3 = scmp.lt.s32.totalorder %s761_s11, %s761_s11 }
  0x3d   :  { %854 = vmatpush3.bf16.msra.mxu0 %v958_v22  ;;  %v1003_v5 = vld [vmem:[#allocation5 + $0x1b8] sm:$0xff]   ;;  %v44_v6 = vld [vmem:[#allocation2 + $0x10] sm:$0xff]  ;;  %p1053_p2 = scmp.ne.s32.totalorder %s761_s11, %s1052_s12  ;;  %p1058_p4 = scmp.lt.s32.totalorder %s1052_s12, %s1052_s12 }
  0x3e   :  { %876 = vmatpush3.bf16.msra.mxu1 %v959_v23  ;;  %855 = vmatprep.subr.bf16.mxu0 %v960_v24  ;;  %v775_v7 = vcombine.low %v44_v6, %v44_v6  ;;  %v776_v8 = vcombine.high %v44_v6, %v44_v6  ;;  %v45_v9 = vld [vmem:[#allocation2 + $0x18] sm:$0xff] }
  0x3f   :  { %877 = vmatprep.subr.bf16.mxu1 %v961_v25  ;;  %v777_v10 = vcombine.low %v45_v9, %v45_v9  ;;  %v778_v11 = vcombine.high %v45_v9, %v45_v9  ;;  %p1059_p5 = por %p1058_p4, %p1057_p3 }
  0x41   :  { %856 = vmatpush3.bf16.msra.mxu0 %v962_v26  ;;  %p1060_p6 = pnand %p1059_p5, %p1053_p2 }
  0x42   :  { %878 = vmatpush3.bf16.msra.mxu1 %v963_v27  ;;  %857 = vmatprep.subr.bf16.mxu0 %v964_v28 }
  0x43   :  { %879 = vmatprep.subr.bf16.mxu1 %v965_v29 }
  0x45   :  { %858 = vmatpush3.bf16.msra.mxu0 %v966_v30 }
  0x46   :  { %880 = vmatpush3.bf16.msra.mxu1 %v967_v31  ;;  %887 = vmatprep.subr.bf16.mxu0 %v972_v38 }
  0x47   :  { %909 = vmatprep.subr.bf16.mxu1 %v973_v39 }
  0x48   :  { %626 = vmatmul.mubr.bf16.vlgmr.msra.gmra.mrb[0].mxu0 %v771_v34 }
  0x49   :  { %666 = vmatmul.mubr.bf16.vlgmr.msra.gmra.mrb[0].mxu1 %v773_v36  ;;  %888 = vmatpush3.bf16.msra.mxu0 %v974_v40 }
  0x4a   :  { %910 = vmatpush3.bf16.msra.mxu1 %v975_v41  ;;  %889 = vmatprep.subr.bf16.mxu0 %v976_v42 }
  0x4b   :  { %911 = vmatprep.subr.bf16.mxu1 %v977_v43  ;;  %705 = vmatprep.mubr.bf16.mxu0 %v776_v8 }
  0x4c   :  { %745 = vmatprep.mubr.bf16.mxu1 %v778_v11 }
  0x4d   :  { %890 = vmatpush3.bf16.msra.mxu0 %v978_v44 }
  0x4e   :  { %912 = vmatpush3.bf16.msra.mxu1 %v979_v45  ;;  %891 = vmatprep.subr.bf16.mxu0 %v980_v46 }
  0x4f   :  { %913 = vmatprep.subr.bf16.mxu1 %v981_v47 }
  0x51   :  { %892 = vmatpush3.bf16.msra.mxu0 %v982_v48 }
  0x52   :  { %914 = vmatpush3.bf16.msra.mxu1 %v983_v49  ;;  %893 = vmatprep.subr.bf16.mxu0 %v984_v50 }
  0x53   :  { %915 = vmatprep.subr.bf16.mxu1 %v985_v51 }
  0x55   :  { %894 = vmatpush3.bf16.msra.mxu0 %v986_v52 }
  0x56   :  { %916 = vmatpush3.bf16.msra.mxu1 %v987_v53  ;;  %895 = vmatprep.subr.bf16.mxu0 %v988_v54 }
  0x57   :  { %917 = vmatprep.subr.bf16.mxu1 %v989_v55 }
  0x59   :  { %896 = vmatpush3.bf16.msra.mxu0 %v990_v56 }
  0x5a   :  { %918 = vmatpush3.bf16.msra.mxu1 %v991_v57  ;;  %897 = vmatprep.subr.bf16.mxu0 %v992_v58 }
  0x5b   :  { %919 = vmatprep.subr.bf16.mxu1 %v993_v59 }
  0x5d   :  { %898 = vmatpush3.bf16.msra.mxu0 %v994_v60 }
  0x5e   :  { %920 = vmatpush3.bf16.msra.mxu1 %v995_v61  ;;  %899 = vmatprep.subr.bf16.mxu0 %v996_v62 }
  0x5f   :  { %921 = vmatprep.subr.bf16.mxu1 %v997_v63 }
  0x61   :  { %900 = vmatpush3.bf16.msra.mxu0 %v998_v0 }
  0x62   :  { %922 = vmatpush3.bf16.msra.mxu1 %v999_v1  ;;  %901 = vmatprep.subr.bf16.mxu0 %v1000_v2 }
  0x63   :  { %923 = vmatprep.subr.bf16.mxu1 %v1001_v3 }
  0x65   :  { %902 = vmatpush3.bf16.msra.mxu0 %v1002_v4 }
  0x66   :  { %924 = vmatpush3.bf16.msra.mxu1 %v1003_v5 }
  0x68   :  { %706 = vmatmul.mubr.bf16.vlgmr.msra.gmra.mrb[4].mxu0 %v775_v7 }
  0x69   :  { %746 = vmatmul.mubr.bf16.vlgmr.msra.gmra.mrb[4].mxu1 %v777_v10 }
 0x11b   :  { %v859_v12 = vpop.f32.mrb[0].mxu0 }
 0x11c   :  { %v881_v13 = vpop.f32.mrb[0].mxu1  ;;  %v860_v15 = vpop.f32.mrb[1].mxu0 }
 0x11d   :  { %v882_v16 = vpop.f32.mrb[1].mxu1  ;;  %v861_v17 = vadd.f32 %v860_v15, %v859_v12  ;;  %v862_v19 = vpop.f32.mrb[2].mxu0 }
 0x11e   :  { %v883_v18 = vadd.f32 %v882_v16, %v881_v13  ;;  %v884_v20 = vpop.f32.mrb[2].mxu1  ;;  %v863_v21 = vpop.f32.mrb[3].mxu0 }
 0x11f   :  { %v885_v22 = vpop.f32.mrb[3].mxu1  ;;  %v628_v23 = vadd.f32 %v861_v17, %v770_v14 }
 0x121   :  { %v668_v24 = vadd.f32 %v883_v18, %v628_v23 }
 0x13b   :  { %v903_v25 = vpop.f32.mrb[4].mxu0 }
 0x13c   :  { %v925_v26 = vpop.f32.mrb[4].mxu1  ;;  %v904_v27 = vpop.f32.mrb[5].mxu0 }
 0x13d   :  { %v926_v28 = vpop.f32.mrb[5].mxu1  ;;  %v905_v29 = vadd.f32 %v904_v27, %v903_v25  ;;  %v906_v31 = vpop.f32.mrb[6].mxu0 }
 0x13e   :  { %v927_v30 = vadd.f32 %v926_v28, %v925_v26  ;;  %v928_v32 = vpop.f32.mrb[6].mxu1  ;;  %v907_v33 = vpop.f32.mrb[7].mxu0 }
 0x13f   :  { %v929_v34 = vpop.f32.mrb[7].mxu1  ;;  %v708_v35 = vadd.f32 %v905_v29, %v668_v24 }
 0x141   :  { %v748_v36 = vadd.f32 %v927_v30, %v708_v35 }
 0x143   :  { %753 = vst [vmem:[#allocation7] sm:$0xff] %v748_v36 }
 0x144   :  { %1063 = shalt.err (!%p1060_p6)
}
 0x145   :  { %s1064_s15 = scalar_lea.hbm %s1154_s3, 128 }
 0x146   :  { %p1065_p7 = scmp.ne.s32.totalorder %s1154_s3, %s1064_s15  ;;  %p1068_p8 = scmp.lt.u32.totalorder %s1064_s15, %s1154_s3 }
 0x148   :  { %p1070_p9 = pnand %p1068_p8, %p1065_p7 }
 0x14a   :  { %1073 = shalt.err (!%p1070_p9)
}
 0x14b   :  { %763 = dma.vmem_to_hbm [thread:$0]  %s761_s11, 128, %s1154_s3, [#allocation4]  }
 0x14c   :  { %1078 = dma.done.wait [#allocation4], 128  }
 0x14d   :  { %1079 = vsyncadd [#allocation4], 4294967168 }
 0x14e   :  { %767 = vsyncpa [#allocation3], 1 }
 0x14f   :  { %768 = vsyncpa [#allocation6], 1 }
 0x150   :  { %769 = vsyncpa [#allocation4], 1 }

</bundles_post_ra>
